<compile_context>
chip_gen: v7x
topology: tpu7x:2x2x1
jax: 0.10.0
libtpu: 0.0.40
codegen_flags: <defaults>
</compile_context>

<pallas_src>
import jax
import jax.numpy as jnp
import numpy as np
from jax.experimental import pallas as pl
from jax.experimental.pallas import tpu as pltpu

_LANES = 512        # lane-dense width (multiple of 128)
_TILE_ROWS = 1024   # (1024, 512) f32 tile = 2 MiB
_VMEM_LIMIT = 32 * 1024 * 1024


# --------------------------- layout helpers (no transpose) ---------------------------

def _lane_dense(arrays):
    """Flatten same-shaped arrays to (rows, _LANES); edge-pad the tail so the row count
    is either a single full block or a multiple of _TILE_ROWS.  Edge padding repeats the
    last element, so min/max stats are unaffected and padded quantized values are finite
    (they are sliced off on the way out)."""
    n = arrays[0].size
    rows_raw = -(-n // _LANES)
    if rows_raw <= _TILE_ROWS:
        tile_rows = rows_raw                      # one block == full array (always legal)
        rows = rows_raw
    else:
        tile_rows = _TILE_ROWS                    # (1024, 512): divisible by (8, 128)
        rows = -(-rows_raw // tile_rows) * tile_rows
    total = rows * _LANES
    outs = []
    for a in arrays:
        f = a.reshape(-1)
        if total != n:
            f = jnp.pad(f, (0, total - n), mode="edge")
        outs.append(f.reshape(rows, _LANES))
    return outs, n, tile_rows


def _from_lane_dense(y2d, n, shape):
    return y2d.reshape(-1)[:n].reshape(shape)


# --------------------------------- Pallas kernels ------------------------------------

def _minmax_tail(k, tmin, tmax, min_ref, max_ref):
    @pl.when(k == 0)
    def _():
        min_ref[...] = tmin
        max_ref[...] = tmax

    @pl.when(k > 0)
    def _():
        min_ref[...] = jnp.minimum(min_ref[...], tmin)
        max_ref[...] = jnp.maximum(max_ref[...], tmax)


def _minmax_kernel_x(x_ref, min_ref, max_ref):
    """Partial min/max of x, accumulated along the (arbitrary) reduction grid axis."""
    k = pl.program_id(1)
    v = x_ref[...].astype(jnp.float32)
    tmin = jnp.broadcast_to(jnp.min(v, axis=0, keepdims=True), min_ref.shape)
    tmax = jnp.broadcast_to(jnp.max(v, axis=0, keepdims=True), max_ref.shape)
    _minmax_tail(k, tmin, tmax, min_ref, max_ref)


def _minmax_kernel_xid(x_ref, id_ref, min_ref, max_ref):
    """Partial min/max of (x + id)."""
    k = pl.program_id(1)
    v = x_ref[...].astype(jnp.float32) + id_ref[...].astype(jnp.float32)
    tmin = jnp.broadcast_to(jnp.min(v, axis=0, keepdims=True), min_ref.shape)
    tmax = jnp.broadcast_to(jnp.max(v, axis=0, keepdims=True), max_ref.shape)
    _minmax_tail(k, tmin, tmax, min_ref, max_ref)


def _make_quant_kernels(bit_width):
    qmin = -float(2 ** (bit_width - 1))
    qmax = float(2 ** (bit_width - 1) - 1)

    def q(v, inv_s):
        # reciprocal-multiply instead of divide (<=1 ulp vs true division before round)
        return jnp.clip(jnp.round(v * inv_s), qmin, qmax)

    def kernel_x(s_ref, x_ref, out_ref):
        s, inv_s = s_ref[0], s_ref[1]
        x = x_ref[...].astype(jnp.float32)
        out_ref[...] = (q(x, inv_s) * s).astype(out_ref.dtype)

    def kernel_xid(s_ref, x_ref, id_ref, out_ref):
        s, inv_s = s_ref[0], s_ref[1]
        x = x_ref[...].astype(jnp.float32)
        idv = id_ref[...].astype(jnp.float32)
        out_ref[...] = ((q(x, inv_s) + q(idv, inv_s)) * s).astype(out_ref.dtype)

    return kernel_x, kernel_xid


def _add_kernel(x_ref, id_ref, out_ref):
    out_ref[...] = (x_ref[...] + id_ref[...]).astype(out_ref.dtype)


# -------------------------------- pallas_call wrappers --------------------------------

def _per_tensor_minmax(x2d, id2d, tile_rows):
    """Global (scalar) min/max of x (+ id) via a grid-accumulated Pallas reduction."""
    rows, lanes = x2d.shape
    nblk = rows // tile_rows
    num_par = 2 if (nblk >= 2 and nblk % 2 == 0) else 1     # cross-TC split on megacore
    k_steps = nblk // num_par

    def idx(p, k):
        return (p * k_steps + k, 0)

    data_spec = pl.BlockSpec((tile_rows, lanes), idx)
    in_specs, args, kernel = [data_spec], [x2d], _minmax_kernel_x
    if id2d is not None:
        in_specs.append(data_spec)
        args.append(id2d)
        kernel = _minmax_kernel_xid

    out_spec = pl.BlockSpec((8, lanes), lambda p, k: (p, 0))
    vmin, vmax = pl.pallas_call(
        kernel,
        out_shape=(jax.ShapeDtypeStruct((8 * num_par, lanes), jnp.float32),
                   jax.ShapeDtypeStruct((8 * num_par, lanes), jnp.float32)),
        grid=(num_par, k_steps),
        in_specs=in_specs,
        out_specs=(out_spec, out_spec),
        compiler_params=pltpu.CompilerParams(
            dimension_semantics=("parallel", "arbitrary"),
            vmem_limit_bytes=_VMEM_LIMIT),
    )(*args)
    return jnp.min(vmin), jnp.max(vmax)       # tiny final combine in plain JAX


def _quantize_call(x2d, id2d, s_out, tile_rows, bit_width, out_dtype):
    rows, lanes = x2d.shape
    nblk = rows // tile_rows
    s = jnp.asarray(s_out, jnp.float32)
    # TODO(synk): s == 0 (all-zero calibration batch) yields inf/nan, same as the reference.
    scale = jnp.stack([s, 1.0 / s]).astype(jnp.float32)      # [s, inv_s] -> SMEM

    kernel_x, kernel_xid = _make_quant_kernels(bit_width)
    data_spec = pl.BlockSpec((tile_rows, lanes), lambda i: (i, 0))
    in_specs = [pl.BlockSpec(memory_space=pltpu.MemorySpace.SMEM), data_spec]
    args, kernel = [scale, x2d], kernel_x
    if id2d is not None:
        in_specs.append(data_spec)
        args.append(id2d)
        kernel = kernel_xid

    return pl.pallas_call(
        kernel,
        out_shape=jax.ShapeDtypeStruct((rows, lanes), out_dtype),
        grid=(nblk,),
        in_specs=in_specs,
        out_specs=pl.BlockSpec((tile_rows, lanes), lambda i: (i, 0)),
        compiler_params=pltpu.CompilerParams(
            dimension_semantics=("parallel",),
            vmem_limit_bytes=_VMEM_LIMIT),
    )(*args)


def _add_call(x2d, id2d, tile_rows):
    rows, lanes = x2d.shape
    return pl.pallas_call(
        _add_kernel,
        out_shape=jax.ShapeDtypeStruct((rows, lanes), x2d.dtype),
        grid=(rows // tile_rows,),
        in_specs=[pl.BlockSpec((tile_rows, lanes), lambda i: (i, 0))] * 2,
        out_specs=pl.BlockSpec((tile_rows, lanes), lambda i: (i, 0)),
        compiler_params=pltpu.CompilerParams(
            dimension_semantics=("parallel",),
            vmem_limit_bytes=_VMEM_LIMIT),
    )(x2d, id2d)


# ----------------------------------- module port --------------------------------------

class QuantActPallas:
    """Forward-only port of model.quant_modules.QuantAct (MovAvgAbsMax, per-tensor)."""

    def __init__(self, bit_width=8, batches=4, momentum=0.95, do_quant=True):
        self.do_quant = do_quant
        self.bit_width = bit_width
        self.running_stat = batches
        self.momentum = momentum
        self.min_val = jnp.zeros((), jnp.float32)
        self.max_val = jnp.zeros((), jnp.float32)
        # Replaces torch.eq(min_val, max_val).all(): avoids a device->host sync each step.
        self._initialized = False
        self.s_out = None

    def _compute_scaler(self, x_min, x_max):
        x_abs_max = jnp.maximum(jnp.abs(x_max), jnp.abs(x_min))
        return x_abs_max / (2 ** (self.bit_width - 1) - 1)

    def __call__(self, x_hat, s_x=None, id_hat=None, s_id=None):
        if not self.do_quant:
            if id_hat is None:
                return x_hat, 0
            (x2d, id2d), n, tr = _lane_dense([x_hat, id_hat])
            out2d = _add_call(x2d, id2d, tr)
            return _from_lane_dense(out2d, n, x_hat.shape), 0

        has_id = id_hat is not None
        dense, n, tr = _lane_dense([x_hat, id_hat] if has_id else [x_hat])
        x2d = dense[0]
        id2d = dense[1] if has_id else None

        # running-stat (EMA) update.  Per-channel stats collapse to a scalar every step in
        # the original (EMA is linear & monotonic), so global min/max is bit-identical.
        if self.running_stat > 0:
            cur_min, cur_max = _per_tensor_minmax(x2d, id2d, tr)
            if not self._initialized:
                self.min_val = cur_min
                self.max_val = cur_max
                self._initialized = True
            else:
                m = self.momentum
                self.min_val = self.min_val * m + cur_min * (1.0 - m)
                self.max_val = self.max_val * m + cur_max * (1.0 - m)
            self.running_stat -= 1
            if self.running_stat == 0:
                self.s_out = self._compute_scaler(self.min_val, self.max_val)

        s_out = (self._compute_scaler(self.min_val, self.max_val)
                 if self.s_out is None else self.s_out)

        # identity branch is quantized+added only when both s_x and id_hat are given
        quant_id = id2d if (s_x is not None and has_id) else None
        out2d = _quantize_call(x2d, quant_id, s_out, tr, self.bit_width, x_hat.dtype)
        # TODO(synk): round_ste backward (straight-through estimator) is autograd-only;
        # the forward uses plain round, which is what is reproduced here.
        return _from_lane_dense(out2d, n, x_hat.shape), s_out


# ------------------------------------- self-test ---------------------------------------

if __name__ == "__main__":
    key = jax.random.PRNGKey(0)
    k1, k2, k3, k4, k5 = jax.random.split(key, 5)

    bit_width = 8
    n_levels = 2 ** (bit_width - 1)

    def ref_quant(t, s):
        inv = 1.0 / s   # mirror the kernel's reciprocal-multiply form
        return jnp.clip(jnp.round(t * inv), -n_levels, n_levels - 1)

    # --- test 1: NCHW conv activation with identity branch (fresh stats) ---------------
    x1 = jax.random.normal(k1, (2, 4, 16, 16), jnp.float32)
    id1 = jax.random.normal(k2, (2, 4, 16, 16), jnp.float32)
    qact = QuantActPallas(bit_width=bit_width, batches=4, momentum=0.95, do_quant=True)
    out1, s1 = qact(x1, s_x=jnp.float32(1.0), id_hat=id1, s_id=jnp.float32(1.0))
    out1 = jax.block_until_ready(out1)

    v1 = x1 + id1
    min1, max1 = v1.min(), v1.max()
    s1_ref = jnp.maximum(jnp.abs(max1), jnp.abs(min1)) / (n_levels - 1)
    out1_ref = (ref_quant(x1, s1_ref) + ref_quant(id1, s1_ref)) * s1_ref
    np.testing.assert_allclose(np.asarray(out1), np.asarray(out1_ref), rtol=1e-5, atol=1e-5)
    np.testing.assert_allclose(float(s1), float(s1_ref), rtol=1e-6, atol=0.0)

    # --- test 2: second batch exercises the EMA running-stat path ----------------------
    x2 = jax.random.normal(k3, (2, 4, 16, 16), jnp.float32)
    id2 = jax.random.normal(k4, (2, 4, 16, 16), jnp.float32)
    out2, s2 = qact(x2, s_x=jnp.float32(1.0), id_hat=id2, s_id=jnp.float32(1.0))
    out2 = jax.block_until_ready(out2)

    v2 = x2 + id2
    m = 0.95
    min2 = min1 * m + v2.min() * (1.0 - m)
    max2 = max1 * m + v2.max() * (1.0 - m)
    s2_ref = jnp.maximum(jnp.abs(max2), jnp.abs(min2)) / (n_levels - 1)
    out2_ref = (ref_quant(x2, s2_ref) + ref_quant(id2, s2_ref)) * s2_ref
    np.testing.assert_allclose(np.asarray(out2), np.asarray(out2_ref), rtol=1e-5, atol=1e-5)

    # --- test 3: no identity branch + shape that needs lane padding --------------------
    x3 = jax.random.normal(k5, (2, 3, 7, 5), jnp.float32)
    qact3 = QuantActPallas(bit_width=bit_width, batches=2, momentum=0.95, do_quant=True)
    out3, s3 = qact3(x3)
    out3 = jax.block_until_ready(out3)
    s3_ref = jnp.maximum(jnp.abs(x3.max()), jnp.abs(x3.min())) / (n_levels - 1)
    out3_ref = ref_quant(x3, s3_ref) * s3_ref
    np.testing.assert_allclose(np.asarray(out3), np.asarray(out3_ref), rtol=1e-5, atol=1e-5)

    # --- test 4: do_quant=False residual add --------------------------------------------
    qact4 = QuantActPallas(do_quant=False)
    out4, zero = qact4(x1, id_hat=id1)
    out4 = jax.block_until_ready(out4)
    np.testing.assert_allclose(np.asarray(out4), np.asarray(x1 + id1), rtol=1e-6, atol=1e-6)

    print("KERNEL_OK")
</pallas_src>

<mosaic_0001>
module attributes {stable_mosaic.version = 11 : i64} {
  func.func @_minmax_kernel_xid(%arg0: i32, %arg1: i32, %arg2: memref<4x512xf32, #tpu.memory_space<vmem>>, %arg3: memref<4x512xf32, #tpu.memory_space<vmem>>, %arg4: memref<8x512xf32, #tpu.memory_space<vmem>>, %arg5: memref<8x512xf32, #tpu.memory_space<vmem>>) attributes {dimension_semantics = [#tpu.dimension_semantics<parallel>, #tpu.dimension_semantics<arbitrary>], iteration_bounds = array<i64: 1, 1>, scalar_prefetch = 0 : i64, scratch_operands = 0 : i64, tpu.core_type = #tpu.core_type<tc>, window_params = [{transform_indices = @transform_0, window_bounds = array<i64: 4, 512>}, {transform_indices = @transform_1, window_bounds = array<i64: 4, 512>}, {transform_indices = @transform_2, window_bounds = array<i64: 8, 512>}, {transform_indices = @transform_3, window_bounds = array<i64: 8, 512>}]} {
    %c0 = arith.constant 0 : index
    %c0_0 = arith.constant 0 : index
    %0 = vector.load %arg2[%c0, %c0_0] : memref<4x512xf32, #tpu.memory_space<vmem>>, vector<4x512xf32>
    %c0_1 = arith.constant 0 : index
    %c0_2 = arith.constant 0 : index
    %1 = vector.load %arg3[%c0_1, %c0_2] : memref<4x512xf32, #tpu.memory_space<vmem>>, vector<4x512xf32>
    %2 = arith.addf %0, %1 : vector<4x512xf32>
    %cst = arith.constant dense<0x7F800000> : vector<512xf32>
    %3 = vector.multi_reduction <minimumf>, %2, %cst [0] : vector<4x512xf32> to vector<512xf32>
    %4 = vector.shape_cast %3 : vector<512xf32> to vector<1x512xf32>
    %5 = vector.shape_cast %4 : vector<1x512xf32> to vector<1x512xf32>
    %6 = vector.broadcast %5 : vector<1x512xf32> to vector<8x512xf32>
    %cst_3 = arith.constant dense<0xFF800000> : vector<512xf32>
    %7 = vector.multi_reduction <maximumf>, %2, %cst_3 [0] : vector<4x512xf32> to vector<512xf32>
    %8 = vector.shape_cast %7 : vector<512xf32> to vector<1x512xf32>
    %9 = vector.shape_cast %8 : vector<1x512xf32> to vector<1x512xf32>
    %10 = vector.broadcast %9 : vector<1x512xf32> to vector<8x512xf32>
    %c0_i32 = arith.constant 0 : i32
    %11 = arith.cmpi eq, %arg1, %c0_i32 : i32
    %12 = arith.extui %11 : i1 to i32
    %c0_i32_4 = arith.constant 0 : i32
    %13 = arith.cmpi ne, %12, %c0_i32_4 : i32
    scf.if %13 {
      %c0_7 = arith.constant 0 : index
      %c0_8 = arith.constant 0 : index
      %17 = vector.load %arg4[%c0_7, %c0_8] : memref<8x512xf32, #tpu.memory_space<vmem>>, vector<8x512xf32>
      tpu.vector_store %arg4[%c0_7, %c0_8], %6 {strides = array<i32>} : memref<8x512xf32, #tpu.memory_space<vmem>>, vector<8x512xf32>,
      %c0_9 = arith.constant 0 : index
      %c0_10 = arith.constant 0 : index
      %18 = vector.load %arg5[%c0_9, %c0_10] : memref<8x512xf32, #tpu.memory_space<vmem>>, vector<8x512xf32>
      tpu.vector_store %arg5[%c0_9, %c0_10], %10 {strides = array<i32>} : memref<8x512xf32, #tpu.memory_space<vmem>>, vector<8x512xf32>,
    } else {
    }
    %c0_i32_5 = arith.constant 0 : i32
    %14 = arith.cmpi sgt, %arg1, %c0_i32_5 : i32
    %15 = arith.extui %14 : i1 to i32
    %c0_i32_6 = arith.constant 0 : i32
    %16 = arith.cmpi ne, %15, %c0_i32_6 : i32
    scf.if %16 {
      %c0_7 = arith.constant 0 : index
      %c0_8 = arith.constant 0 : index
      %17 = vector.load %arg4[%c0_7, %c0_8] : memref<8x512xf32, #tpu.memory_space<vmem>>, vector<8x512xf32>
      %18 = arith.minimumf %17, %6 : vector<8x512xf32>
      %c0_9 = arith.constant 0 : index
      %c0_10 = arith.constant 0 : index
      %19 = vector.load %arg4[%c0_9, %c0_10] : memref<8x512xf32, #tpu.memory_space<vmem>>, vector<8x512xf32>
      tpu.vector_store %arg4[%c0_9, %c0_10], %18 {strides = array<i32>} : memref<8x512xf32, #tpu.memory_space<vmem>>, vector<8x512xf32>,
      %c0_11 = arith.constant 0 : index
      %c0_12 = arith.constant 0 : index
      %20 = vector.load %arg5[%c0_11, %c0_12] : memref<8x512xf32, #tpu.memory_space<vmem>>, vector<8x512xf32>
      %21 = arith.maximumf %20, %10 : vector<8x512xf32>
      %c0_13 = arith.constant 0 : index
      %c0_14 = arith.constant 0 : index
      %22 = vector.load %arg5[%c0_13, %c0_14] : memref<8x512xf32, #tpu.memory_space<vmem>>, vector<8x512xf32>
      tpu.vector_store %arg5[%c0_13, %c0_14], %21 {strides = array<i32>} : memref<8x512xf32, #tpu.memory_space<vmem>>, vector<8x512xf32>,
    } else {
    }
    return
  }
  func.func @transform_0(%arg0: i32, %arg1: i32) -> (i32, i32) {
    %c1_i32 = arith.constant 1 : i32
    %0 = arith.muli %arg0, %c1_i32 : i32
    %1 = arith.addi %0, %arg1 : i32
    %c0_i32 = arith.constant 0 : i32
    %c0_i32_0 = arith.constant 0 : i32
    return %1, %c0_i32 : i32, i32
  }
  func.func @transform_1(%arg0: i32, %arg1: i32) -> (i32, i32) {
    %c1_i32 = arith.constant 1 : i32
    %0 = arith.muli %arg0, %c1_i32 : i32
    %1 = arith.addi %0, %arg1 : i32
    %c0_i32 = arith.constant 0 : i32
    %c0_i32_0 = arith.constant 0 : i32
    return %1, %c0_i32 : i32, i32
  }
  func.func @transform_2(%arg0: i32, %arg1: i32) -> (i32, i32) {
    %c0_i32 = arith.constant 0 : i32
    %c0_i32_0 = arith.constant 0 : i32
    return %arg0, %c0_i32 : i32, i32
  }
  func.func @transform_3(%arg0: i32, %arg1: i32) -> (i32, i32) {
    %c0_i32 = arith.constant 0 : i32
    %c0_i32_0 = arith.constant 0 : i32
    return %arg0, %c0_i32 : i32, i32
  }
}

</mosaic_0001>

<bundles_post_ra>
// kernel: tpu_custom_call.1
= control target key start
LH: loop header
LB: loop body
LE: loop exit
PB: predicated region body
PF: predicated region fallthrough
CT: control target
= control target key end

     0   :  { %9 = vsyncpa [#allocation3], 0  ;;  %s368_s0 = inlined_call_operand.hbm [shape: f32[4,512], index: 0, kind: input, shape index: {}]   ;;  %s369_s1 = inlined_call_operand.hbm [shape: f32[4,512], index: 1, kind: input, shape index: {}]   ;;  %s370_s2 = inlined_call_operand.hbm [shape: f32[8,512], index: 2, kind: output, shape index: {0}]   ;;  %s371_s3 = inlined_call_operand.hbm [shape: f32[8,512], index: 3, kind: output, shape index: {1}]  }
   0x1   :  { %10 = vsyncpa [#allocation6], 0 }
   0x2   :  { %11 = vsyncpa [#allocation4], 0 }
   0x3   :  { %12 = vsyncpa [#allocation9], 0  ;;  %s288_s12 = smov [#allocation2]   ;;  %s289_s14 = smov [#allocation5]  }
   0x4   :  { %s23_s13 = sshll.u32 %s288_s12, 4  ;;  %s37_s15 = sshll.u32 %s289_s14, 4  ;;  %s24_s13 = int_to_ptr.vmem [resolvable:$true] %s23_s13  ;;  %s38_s15 = int_to_ptr.vmem [resolvable:$true] %s37_s15 }
   0x5   :  { %s192_s18 = scalar_lea.hbm %s368_s0, 256 }
   0x6   :  { %p193_p0 = scmp.ne.s32.totalorder %s368_s0, %s192_s18  ;;  %p196_p1 = scmp.lt.u32.totalorder %s192_s18, %s368_s0 }
   0x8   :  { %p198_p2 = pnand %p196_p1, %p193_p0 }
   0xa   :  { %201 = shalt.err (!%p198_p2)
}
   0xb   :  { %s202_s23 = scalar_lea.vmem %s24_s13, 256  ;;  %p207_p4 = scmp.lt.s32.totalorder %s24_s13, %s24_s13 }
   0xc   :  { %p203_p3 = scmp.ne.s32.totalorder %s24_s13, %s202_s23  ;;  %p208_p5 = scmp.lt.s32.totalorder %s202_s23, %s202_s23 }
   0xe   :  { %p209_p6 = por %p208_p5, %p207_p4 }
  0x10   :  { %p210_p7 = pnand %p209_p6, %p203_p3 }
  0x12   :  { %213 = shalt.err (!%p210_p7)
}
  0x13   :  { %26 = dma.hbm_to_vmem [thread:$0]  %s368_s0, 256, %s24_s13, [#allocation3]  }
  0x14   :  { %s214_s28 = scalar_lea.hbm %s369_s1, 256 }
  0x15   :  { %p215_p8 = scmp.ne.s32.totalorder %s369_s1, %s214_s28  ;;  %p218_p9 = scmp.lt.u32.totalorder %s214_s28, %s369_s1 }
  0x17   :  { %p220_p10 = pnand %p218_p9, %p215_p8 }
  0x19   :  { %223 = shalt.err (!%p220_p10)
}
  0x1a   :  { %s224_s6 = scalar_lea.vmem %s38_s15, 256  ;;  %p229_p12 = scmp.lt.s32.totalorder %s38_s15, %s38_s15 }
  0x1b   :  { %p225_p11 = scmp.ne.s32.totalorder %s38_s15, %s224_s6  ;;  %p230_p13 = scmp.lt.s32.totalorder %s224_s6, %s224_s6 }
  0x1d   :  { %p231_p0 = por %p230_p13, %p229_p12 }
  0x1f   :  { %p232_p1 = pnand %p231_p0, %p225_p11 }
  0x21   :  { %235 = shalt.err (!%p232_p1)
}
  0x22   :  { %40 = dma.hbm_to_vmem [thread:$0]  %s369_s1, 256, %s38_s15, [#allocation6]  }
  0x23   :  { %280 = dma.done.wait [#allocation3], 256  }
  0x24   :  { %281 = vsyncadd [#allocation3], 4294967040 }
  0x25   :  { %282 = dma.done.wait [#allocation6], 256  }
  0x26   :  { %283 = vsyncadd [#allocation6], 4294967040  ;;  %v49_v0 = vld [vmem:[#allocation2] sm:$0xff]  ;;  %v51_v1 = vld [vmem:[#allocation5] sm:$0xff]  ;;  %vm61_vm0 = vcmask 1043456   ;;  %s290_s1 = smov [#allocation7]  }
  0x27   :  { %v50_v2 = vld [vmem:[#allocation2 + $0x8] sm:$0xff]  ;;  %v53_v3 = vadd.f32 %v51_v1, %v49_v0  ;;  %v52_v4 = vld [vmem:[#allocation5 + $0x8] sm:$0xff]  ;;  %s164_s8 = sshll.u32 %s290_s1, 4  ;;  %s291_s9 = smov [#allocation8]   ;;  %s165_s8 = int_to_ptr.vmem [resolvable:$true] %s164_s8 }
  0x28   :  { %v54_v5 = vadd.f32 %v52_v4, %v50_v2  ;;  %s174_s10 = sshll.u32 %s291_s9, 4  ;;  %s236_s11 = scalar_lea.vmem %s165_s8, 512  ;;  %s175_s10 = int_to_ptr.vmem [resolvable:$true] %s174_s10 }
  0x29   :  { %v62_v6 = vsel %vm61_vm0, %v53_v3, inf  ;;  %v57_v7 = vcombine.high %v53_v3, %v53_v3  ;;  %v90_v8 = vsel %vm61_vm0, %v53_v3, -inf  ;;  %p237_p2 = scmp.ne.s32.totalorder %s165_s8, %s236_s11  ;;  %p241_p3 = scmp.lt.s32.totalorder %s165_s8, %s165_s8 }
  0x2a   :  { %v63_v9 = vrot.slane %v62_v6, 4  ;;  %v76_v10 = vsel %vm61_vm0, %v54_v5, inf  ;;  %v58_v11 = vcombine.high %v54_v5, %v54_v5  ;;  %v91_v12 = vrot.slane %v90_v8, 4  ;;  %p242_p4 = scmp.lt.s32.totalorder %s236_s11, %s236_s11 }
  0x2b   :  { %v69_v13 = vsel %vm61_vm0, %v57_v7, inf  ;;  %v77_v14 = vrot.slane %v76_v10, 4  ;;  %v97_v15 = vsel %vm61_vm0, %v57_v7, -inf  ;;  %v104_v16 = vsel %vm61_vm0, %v54_v5, -inf }
  0x2c   :  { %v64_v17 = vmin.f32 %v62_v6, %v63_v9  ;;  %v70_v18 = vrot.slane %v69_v13, 4  ;;  %v83_v19 = vsel %vm61_vm0, %v58_v11, inf  ;;  %v92_v20 = vmax.f32 %v90_v8, %v91_v12  ;;  %p243_p5 = por %p242_p4, %p241_p3 }
  0x2d   :  { %v78_v21 = vmin.f32 %v76_v10, %v77_v14  ;;  %v84_v22 = vrot.slane %v83_v19, 4  ;;  %v98_v23 = vrot.slane %v97_v15, 4  ;;  %v105_v24 = vrot.slane %v104_v16, 4 }
  0x2e   :  { %v65_v25 = vrot.slane %v64_v17, 2  ;;  %v71_v26 = vmin.f32 %v69_v13, %v70_v18  ;;  %v93_v27 = vrot.slane %v92_v20, 2  ;;  %v111_v28 = vsel %vm61_vm0, %v58_v11, -inf  ;;  %p244_p6 = pnand %p243_p5, %p237_p2 }
  0x2f   :  { %v79_v29 = vrot.slane %v78_v21, 2  ;;  %v85_v30 = vmin.f32 %v83_v19, %v84_v22  ;;  %v99_v31 = vmax.f32 %v97_v15, %v98_v23  ;;  %v106_v32 = vmax.f32 %v104_v16, %v105_v24 }
  0x30   :  { %v66_v33 = vmin.f32 %v64_v17, %v65_v25  ;;  %v72_v34 = vrot.slane %v71_v26, 2  ;;  %v94_v35 = vmax.f32 %v92_v20, %v93_v27  ;;  %v112_v36 = vrot.slane %v111_v28, 4 }
  0x31   :  { %v80_v37 = vmin.f32 %v78_v21, %v79_v29  ;;  %v86_v38 = vrot.slane %v85_v30, 2  ;;  %v100_v39 = vrot.slane %v99_v31, 2  ;;  %v107_v40 = vrot.slane %v106_v32, 2 }
  0x32   :  { %v67_v41 = vrot.slane %v66_v33, 1  ;;  %v73_v42 = vmin.f32 %v71_v26, %v72_v34  ;;  %v95_v43 = vrot.slane %v94_v35, 1  ;;  %v113_v44 = vmax.f32 %v111_v28, %v112_v36 }
  0x33   :  { %v81_v45 = vrot.slane %v80_v37, 1  ;;  %v87_v46 = vmin.f32 %v85_v30, %v86_v38  ;;  %v101_v47 = vmax.f32 %v99_v31, %v100_v39  ;;  %v108_v48 = vmax.f32 %v106_v32, %v107_v40 }
  0x34   :  { %v68_v49 = vmin.f32 %v66_v33, %v67_v41  ;;  %v74_v50 = vrot.slane %v73_v42, 1  ;;  %v96_v51 = vmax.f32 %v94_v35, %v95_v43  ;;  %v114_v52 = vrot.slane %v113_v44, 2 }
  0x35   :  { %v82_v53 = vmin.f32 %v80_v37, %v81_v45  ;;  %v88_v54 = vrot.slane %v87_v46, 1  ;;  %v102_v55 = vrot.slane %v101_v47, 1  ;;  %v109_v56 = vrot.slane %v108_v48, 1 }
  0x36   :  { %122 = vst [vmem:[#allocation7] sm:$0xff] %v68_v49  ;;  %v75_v57 = vmin.f32 %v73_v42, %v74_v50  ;;  %126 = vst [vmem:[#allocation8] sm:$0xff] %v96_v51  ;;  %v115_v58 = vmax.f32 %v113_v44, %v114_v52 }
  0x37   :  { %124 = vst [vmem:[#allocation7 + $0x10] sm:$0xff] %v82_v53  ;;  %v89_v59 = vmin.f32 %v87_v46, %v88_v54  ;;  %v103_v60 = vmax.f32 %v101_v47, %v102_v55  ;;  %v110_v61 = vmax.f32 %v108_v48, %v109_v56 }
  0x38   :  { %123 = vst [vmem:[#allocation7 + $0x8] sm:$0xff] %v75_v57  ;;  %v116_v62 = vrot.slane %v115_v58, 1 }
  0x39   :  { %125 = vst [vmem:[#allocation7 + $0x18] sm:$0xff] %v89_v59  ;;  %127 = vst [vmem:[#allocation8 + $0x8] sm:$0xff] %v103_v60 }
  0x3a   :  { %128 = vst [vmem:[#allocation8 + $0x10] sm:$0xff] %v110_v61  ;;  %v117_v63 = vmax.f32 %v115_v58, %v116_v62 }
  0x3b   :  { %247 = shalt.err (!%p244_p6)
}
  0x3c   :  { %s248_s14 = scalar_lea.hbm %s370_s2, 512 }
  0x3d   :  { %p249_p7 = scmp.ne.s32.totalorder %s370_s2, %s248_s14  ;;  %p252_p8 = scmp.lt.u32.totalorder %s248_s14, %s370_s2 }
  0x3f   :  { %p254_p9 = pnand %p252_p8, %p249_p7 }
  0x41   :  { %257 = shalt.err (!%p254_p9)
}
  0x42   :  { %167 = dma.vmem_to_hbm [thread:$0]  %s165_s8, 512, %s370_s2, [#allocation4]   ;;  %129 = vst [vmem:[#allocation8 + $0x18] sm:$0xff] %v117_v63 }
  0x43   :  { %s258_s21 = scalar_lea.vmem %s175_s10, 512  ;;  %p263_p11 = scmp.lt.s32.totalorder %s175_s10, %s175_s10 }
  0x44   :  { %p259_p10 = scmp.ne.s32.totalorder %s175_s10, %s258_s21  ;;  %p264_p12 = scmp.lt.s32.totalorder %s258_s21, %s258_s21 }
  0x46   :  { %p265_p13 = por %p264_p12, %p263_p11 }
  0x48   :  { %p266_p0 = pnand %p265_p13, %p259_p10 }
  0x4a   :  { %269 = shalt.err (!%p266_p0)
}
  0x4b   :  { %s270_s24 = scalar_lea.hbm %s371_s3, 512 }
  0x4c   :  { %p271_p1 = scmp.ne.s32.totalorder %s371_s3, %s270_s24  ;;  %p274_p2 = scmp.lt.u32.totalorder %s270_s24, %s371_s3 }
  0x4e   :  { %p276_p3 = pnand %p274_p2, %p271_p1 }
  0x50   :  { %279 = shalt.err (!%p276_p3)
}
  0x51   :  { %177 = dma.vmem_to_hbm [thread:$0]  %s175_s10, 512, %s371_s3, [#allocation9]  }
  0x52   :  { %284 = dma.done.wait [#allocation4], 512  }
  0x53   :  { %285 = vsyncadd [#allocation4], 4294966784 }
  0x54   :  { %286 = dma.done.wait [#allocation9], 512  }
  0x55   :  { %287 = vsyncadd [#allocation9], 4294966784 }
  0x56   :  { %184 = vsyncpa [#allocation3], 1 }
  0x57   :  { %185 = vsyncpa [#allocation6], 1 }
  0x58   :  { %186 = vsyncpa [#allocation4], 1 }
  0x59   :  { %187 = vsyncpa [#allocation9], 1 }

</bundles_post_ra>
